<compile_context>
chip_gen: v7x
topology: tpu7x:2x2x1
jax: 0.10.0
libtpu: 0.0.40
codegen_flags: <defaults>
</compile_context>

<pallas_src>
import functools
import math

import jax
import jax.numpy as jnp
from jax import lax
from jax.experimental import pallas as pl
from jax.experimental.pallas import tpu as pltpu

_EPS = 1e-5          # nn.LayerNorm default
_LANES = 128
_SUBLANES = 8


def _round_up(x, m):
    return ((x + m - 1) // m) * m


def _tpu_vmem_capacity_bytes():
    """Per-TensorCore VMEM capacity; falls back to 128 MiB if unavailable."""
    try:
        info = pltpu.get_tpu_info()
        return int(getattr(info, "vmem_capacity_bytes", 128 << 20))
    except Exception:
        return 128 << 20


def _ln_fold_kernel(x_ref, b_ref, sel_ref, selg_ref, o_ref, *, inv_d):
    """LayerNorm on a lane-folded (rows, k*D) tile.

    Each folded row holds k original feature rows (D channels each) laid out
    contiguously along the lane axis.  Per-group mean/var come from a single
    pass (sum, sum-of-squares) via small MXU matmuls against the (kD, k)
    segment-selection matrix; gamma is pre-folded into the broadcast matrix
    selg so the output is produced in affine form: y = x*scale - shift + beta.
    Every op is strictly row-local, so masked tail rows cannot contaminate
    real rows.
    """
    x = x_ref[...].astype(jnp.float32)                                    # (R, kD)
    sel = sel_ref[...]                                                    # (kD, k)
    selg = selg_ref[...]                                                  # (k, kD)

    s1 = jnp.dot(x, sel, preferred_element_type=jnp.float32)              # (R, k)
    s2 = jnp.dot(x * x, sel, preferred_element_type=jnp.float32)          # (R, k)
    mean = s1 * inv_d
    var = jnp.maximum(s2 * inv_d - mean * mean, 0.0)                      # biased, like torch
    inv = lax.rsqrt(var + _EPS)                                           # (R, k)

    scale = jnp.dot(inv, selg, preferred_element_type=jnp.float32)        # (R, kD) = inv*gamma
    shift = jnp.dot(mean * inv, selg, preferred_element_type=jnp.float32) # (R, kD) = mean*inv*gamma

    o_ref[...] = (x * scale - shift + b_ref[...]).astype(o_ref.dtype)


def _ln_k1_kernel(x_ref, g_ref, b_ref, o_ref, *, inv_d):
    """LayerNorm when D is already a multiple of 128: XLU reduce + lane
    broadcast only — no MXU traffic, no selection-matrix DMAs."""
    x = x_ref[...].astype(jnp.float32)                                    # (R, D)
    s1 = jnp.sum(x, axis=-1, keepdims=True)
    s2 = jnp.sum(x * x, axis=-1, keepdims=True)
    mean = s1 * inv_d
    var = jnp.maximum(s2 * inv_d - mean * mean, 0.0)
    inv = lax.rsqrt(var + _EPS)
    o_ref[...] = ((x - mean) * inv * g_ref[...] + b_ref[...]).astype(o_ref.dtype)


def sparse_tensor_layer_norm(x, gamma, beta, *, block_rows=None,
                             vmem_block_budget_bytes=None):
    """LayerNorm over the last dim of the (N, D) sparse-tensor feature matrix.

    Returns float32 features (the PyTorch forward calls .float()).
    """
    N, D = x.shape
    gamma = gamma.reshape(-1).astype(jnp.float32)
    beta = beta.reshape(-1).astype(jnp.float32)

    # ---- generation-aware budgets (v7x has 64 MiB VMEM / TC, 2 TCs) ----
    vmem_cap = _tpu_vmem_capacity_bytes()
    small_vmem = vmem_cap <= (64 << 20)
    if vmem_block_budget_bytes is None:
        vmem_block_budget_bytes = (8 << 20) if small_vmem else (16 << 20)

    # ---- lane folding: pack k feature rows per lane row so the last dim is a
    # multiple of 128 and every load/store is lane-dense.  Ragged N is padded
    # with zeros (row-local stats -> padding never contaminates real rows). ----
    k = _LANES // math.gcd(D, _LANES)
    kD = k * D
    n_pad = _round_up(N, k)
    if n_pad != N:
        x = jnp.pad(x, ((0, n_pad - N), (0, 0)))
    n_rows = n_pad // k

    # ---- block sizing: biggest row tile whose double-buffered in/out blocks
    # plus an allowance for compiler-materialized f32 temporaries fit the
    # VMEM budget; keep enough (even) grid steps for the v7x megacore. ----
    per_row_bytes = kD * (2 * (x.dtype.itemsize + 4) + 6 * 4)
    if block_rows is None:
        block_rows = max(vmem_block_budget_bytes // per_row_bytes, _SUBLANES)
        block_rows = min(block_rows, 2048)
        block_rows = min(block_rows, _round_up(n_rows, _SUBLANES))
        min_steps = 4 if small_vmem else 2
        if n_rows > min_steps * _SUBLANES and pl.cdiv(n_rows, block_rows) < min_steps:
            block_rows = pl.cdiv(n_rows, min_steps)
    block_rows = max(_round_up(int(block_rows), _SUBLANES), _SUBLANES)

    n_steps = pl.cdiv(n_rows, block_rows)
    if small_vmem and n_steps > 2 and (n_steps % 2 == 1):
        # prefer an even step count so the 2-TC split is balanced and each
        # core still has >= 2 steps to double-buffer.
        block_rows = max(_round_up(pl.cdiv(n_rows, n_steps + 1), _SUBLANES), _SUBLANES)
        n_steps = pl.cdiv(n_rows, block_rows)
    grid = (n_steps,)

    vmem_ceiling = (32 << 20) if small_vmem else (48 << 20)
    vmem_limit = int(min(vmem_ceiling,
                         max(block_rows * per_row_bytes + (8 << 20), 24 << 20)))

    cparams = pltpu.CompilerParams(
        dimension_semantics=("parallel",),
        vmem_limit_bytes=vmem_limit,
    )
    cost = pl.CostEstimate(
        flops=int(8 * n_rows * kD * k + 5 * n_rows * kD),
        transcendentals=int(n_rows * k),
        bytes_accessed=int(n_rows * kD * (x.dtype.itemsize + 4)),
    )
    inv_d = 1.0 / float(D)

    if k == 1:
        # D is already a multiple of 128: lane-dense without folding; no MXU.
        g_f = gamma.reshape(1, D)
        b_f = beta.reshape(1, D)
        out = pl.pallas_call(
            functools.partial(_ln_k1_kernel, inv_d=inv_d),
            out_shape=jax.ShapeDtypeStruct((n_rows, D), jnp.float32),
            grid_spec=pltpu.PrefetchScalarGridSpec(
                num_scalar_prefetch=0,
                grid=grid,
                in_specs=[
                    pl.BlockSpec((block_rows, D), lambda i: (i, 0)),   # features
                    pl.BlockSpec((1, D), lambda i: (0, 0)),            # gamma
                    pl.BlockSpec((1, D), lambda i: (0, 0)),            # beta
                ],
                out_specs=pl.BlockSpec((block_rows, D), lambda i: (i, 0)),
            ),
            compiler_params=cparams,
            cost_estimate=cost,
        )(x, g_f, b_f)
        return out

    # ---- folded path ----
    x_f = x.reshape(n_rows, kD)                              # free row-major reshape
    g_fold = jnp.tile(gamma, k)                              # (kD,)
    b_f = jnp.tile(beta, k).reshape(1, kD)                   # (1, kD)

    # segment-selection matrix: sel[j, g] = 1 iff lane j belongs to group g
    grp = jnp.arange(kD, dtype=jnp.int32) // D
    sel = (grp[:, None] == jnp.arange(k, dtype=jnp.int32)[None, :]).astype(jnp.float32)
    selg = sel.T * g_fold[None, :]                           # (k, kD): broadcast * gamma

    out = pl.pallas_call(
        functools.partial(_ln_fold_kernel, inv_d=inv_d),
        out_shape=jax.ShapeDtypeStruct((n_rows, kD), jnp.float32),
        grid_spec=pltpu.PrefetchScalarGridSpec(
            num_scalar_prefetch=0,
            grid=grid,
            in_specs=[
                pl.BlockSpec((block_rows, kD), lambda i: (i, 0)),   # features (folded)
                pl.BlockSpec((1, kD), lambda i: (0, 0)),            # beta (folded)
                pl.BlockSpec((kD, k), lambda i: (0, 0)),            # segment matrix
                pl.BlockSpec((k, kD), lambda i: (0, 0)),            # broadcast * gamma
            ],
            out_specs=pl.BlockSpec((block_rows, kD), lambda i: (i, 0)),
        ),
        compiler_params=cparams,
        cost_estimate=cost,
    )(x_f, b_f, sel, selg)

    out = out.reshape(n_pad, D)
    if n_pad != N:
        out = out[:N]
    return out


def _reference(x, gamma, beta):
    x = x.astype(jnp.float32)
    mean = jnp.mean(x, axis=-1, keepdims=True)
    var = jnp.mean((x - mean) ** 2, axis=-1, keepdims=True)
    return (x - mean) / jnp.sqrt(var + _EPS) * gamma + beta


if __name__ == "__main__":
    key = jax.random.PRNGKey(0)
    k0, k1, k2, k3, k4 = jax.random.split(key, 5)

    # Case 1: D=32 -> lane-folded path (k=4, folded lane dim 128).
    N, dim = 64, 32
    x = jax.random.normal(k0, (N, dim), dtype=jnp.float32)
    gamma = 1.0 + 0.1 * jax.random.normal(k1, (dim,), dtype=jnp.float32)
    beta = 0.1 * jax.random.normal(k2, (dim,), dtype=jnp.float32)

    out = jax.block_until_ready(sparse_tensor_layer_norm(x, gamma, beta))
    ref = _reference(x, gamma, beta)
    assert out.shape == (N, dim) and out.dtype == jnp.float32
    assert float(jnp.max(jnp.abs(out - ref))) < 1e-4

    # Case 2: ragged N=50, D=48 -> k=8; rows zero-padded to 56, stays lane-dense.
    N2, dim2 = 50, 48
    x2 = jax.random.normal(k3, (N2, dim2), dtype=jnp.float32)
    gamma2 = jnp.ones((dim2,), dtype=jnp.float32)
    beta2 = jnp.zeros((dim2,), dtype=jnp.float32)

    out2 = jax.block_until_ready(sparse_tensor_layer_norm(x2, gamma2, beta2))
    ref2 = _reference(x2, gamma2, beta2)
    assert out2.shape == (N2, dim2) and out2.dtype == jnp.float32
    assert float(jnp.max(jnp.abs(out2 - ref2))) < 1e-4

    # Case 3: D=128 -> k==1 fast path (no MXU, XLU reduce + lane broadcast).
    N3, dim3 = 40, 128
    x3 = jax.random.normal(k4, (N3, dim3), dtype=jnp.float32)
    gamma3 = 1.0 + 0.05 * jnp.ones((dim3,), dtype=jnp.float32)
    beta3 = 0.05 * jnp.ones((dim3,), dtype=jnp.float32)

    out3 = jax.block_until_ready(sparse_tensor_layer_norm(x3, gamma3, beta3))
    ref3 = _reference(x3, gamma3, beta3)
    assert out3.shape == (N3, dim3) and out3.dtype == jnp.float32
    assert float(jnp.max(jnp.abs(out3 - ref3))) < 1e-4

    # TODO(synk): coordinate_map_key / coordinate_manager re-wrapping
    # (assign_feats) is MinkowskiEngine bookkeeping with no compute; the
    # kernel returns the normalized float32 feature matrix only.
    print("KERNEL_OK")
</pallas_src>

<mosaic_0001>
module attributes {stable_mosaic.version = 11 : i64} {
  func.func @_ln_fold_kernel(%arg0: i32, %arg1: memref<16x128xf32, #tpu.memory_space<vmem>>, %arg2: memref<1x128xf32, #tpu.memory_space<vmem>>, %arg3: memref<128x4xf32, #tpu.memory_space<vmem>>, %arg4: memref<4x128xf32, #tpu.memory_space<vmem>>, %arg5: memref<16x128xf32, #tpu.memory_space<vmem>>) attributes {dimension_semantics = [#tpu.dimension_semantics<parallel>], iteration_bounds = array<i64: 1>, scalar_prefetch = 0 : i64, scratch_operands = 0 : i64, tpu.core_type = #tpu.core_type<tc>, window_params = [{transform_indices = @transform_0, window_bounds = array<i64: 16, 128>}, {pipeline_mode = #tpu.pipeline_mode<synchronous>, transform_indices = @transform_1, window_bounds = array<i64: 1, 128>}, {pipeline_mode = #tpu.pipeline_mode<synchronous>, transform_indices = @transform_2, window_bounds = array<i64: 128, 4>}, {pipeline_mode = #tpu.pipeline_mode<synchronous>, transform_indices = @transform_3, window_bounds = array<i64: 4, 128>}, {transform_indices = @transform_4, window_bounds = array<i64: 16, 128>}]} {
    %c0 = arith.constant 0 : index
    %c0_0 = arith.constant 0 : index
    %0 = vector.load %arg1[%c0, %c0_0] : memref<16x128xf32, #tpu.memory_space<vmem>>, vector<16x128xf32>
    %c0_1 = arith.constant 0 : index
    %c0_2 = arith.constant 0 : index
    %1 = vector.load %arg3[%c0_1, %c0_2] : memref<128x4xf32, #tpu.memory_space<vmem>>, vector<128x4xf32>
    %c0_3 = arith.constant 0 : index
    %c0_4 = arith.constant 0 : index
    %2 = vector.load %arg4[%c0_3, %c0_4] : memref<4x128xf32, #tpu.memory_space<vmem>>, vector<4x128xf32>
    %cst = arith.constant dense<0.000000e+00> : vector<16x4xf32>
    %3 = tpu.matmul %0, %1, %cst {dimension_numbers = #tpu.dot_dimension_numbers<[1], [0], [0], [1], [0, 0, 1, 1], [], []>} : vector<16x128xf32>, vector<128x4xf32>, vector<16x4xf32> -> vector<16x4xf32>
    %4 = arith.mulf %0, %0 : vector<16x128xf32>
    %cst_5 = arith.constant dense<0.000000e+00> : vector<16x4xf32>
    %5 = tpu.matmul %4, %1, %cst_5 {dimension_numbers = #tpu.dot_dimension_numbers<[1], [0], [0], [1], [0, 0, 1, 1], [], []>} : vector<16x128xf32>, vector<128x4xf32>, vector<16x4xf32> -> vector<16x4xf32>
    %cst_6 = arith.constant 3.125000e-02 : f32
    %6 = vector.broadcast %cst_6 : f32 to vector<16x4xf32>
    %7 = arith.mulf %3, %6 : vector<16x4xf32>
    %cst_7 = arith.constant 3.125000e-02 : f32
    %8 = vector.broadcast %cst_7 : f32 to vector<16x4xf32>
    %9 = arith.mulf %5, %8 : vector<16x4xf32>
    %10 = arith.mulf %7, %7 : vector<16x4xf32>
    %11 = arith.subf %9, %10 : vector<16x4xf32>
    %cst_8 = arith.constant 0.000000e+00 : f32
    %12 = vector.broadcast %cst_8 : f32 to vector<16x4xf32>
    %13 = arith.maximumf %11, %12 : vector<16x4xf32>
    %cst_9 = arith.constant 9.99999974E-6 : f32
    %14 = vector.broadcast %cst_9 : f32 to vector<16x4xf32>
    %15 = arith.addf %13, %14 : vector<16x4xf32>
    %16 = math.rsqrt %15 : vector<16x4xf32>
    %cst_10 = arith.constant dense<0.000000e+00> : vector<16x128xf32>
    %17 = tpu.matmul %16, %2, %cst_10 {dimension_numbers = #tpu.dot_dimension_numbers<[1], [0], [0], [1], [0, 0, 1, 1], [], []>} : vector<16x4xf32>, vector<4x128xf32>, vector<16x128xf32> -> vector<16x128xf32>
    %18 = arith.mulf %7, %16 : vector<16x4xf32>
    %cst_11 = arith.constant dense<0.000000e+00> : vector<16x128xf32>
    %19 = tpu.matmul %18, %2, %cst_11 {dimension_numbers = #tpu.dot_dimension_numbers<[1], [0], [0], [1], [0, 0, 1, 1], [], []>} : vector<16x4xf32>, vector<4x128xf32>, vector<16x128xf32> -> vector<16x128xf32>
    %20 = arith.mulf %0, %17 : vector<16x128xf32>
    %21 = arith.subf %20, %19 : vector<16x128xf32>
    %c0_12 = arith.constant 0 : index
    %c0_13 = arith.constant 0 : index
    %22 = vector.load %arg2[%c0_12, %c0_13] : memref<1x128xf32, #tpu.memory_space<vmem>>, vector<1x128xf32>
    %23 = vector.broadcast %22 : vector<1x128xf32> to vector<16x128xf32>
    %24 = arith.addf %21, %23 : vector<16x128xf32>
    %c0_14 = arith.constant 0 : index
    %c0_15 = arith.constant 0 : index
    %25 = vector.load %arg5[%c0_14, %c0_15] : memref<16x128xf32, #tpu.memory_space<vmem>>, vector<16x128xf32>
    tpu.vector_store %arg5[%c0_14, %c0_15], %24 {strides = array<i32>} : memref<16x128xf32, #tpu.memory_space<vmem>>, vector<16x128xf32>,
    return
  }
  func.func @transform_0(%arg0: i32) -> (i32, i32) {
    %c0_i32 = arith.constant 0 : i32
    %c0_i32_0 = arith.constant 0 : i32
    return %arg0, %c0_i32 : i32, i32
  }
  func.func @transform_1(%arg0: i32) -> (i32, i32) {
    %c0_i32 = arith.constant 0 : i32
    %c0_i32_0 = arith.constant 0 : i32
    %c0_i32_1 = arith.constant 0 : i32
    return %c0_i32, %c0_i32_0 : i32, i32
  }
  func.func @transform_2(%arg0: i32) -> (i32, i32) {
    %c0_i32 = arith.constant 0 : i32
    %c0_i32_0 = arith.constant 0 : i32
    %c0_i32_1 = arith.constant 0 : i32
    return %c0_i32, %c0_i32_0 : i32, i32
  }
  func.func @transform_3(%arg0: i32) -> (i32, i32) {
    %c0_i32 = arith.constant 0 : i32
    %c0_i32_0 = arith.constant 0 : i32
    %c0_i32_1 = arith.constant 0 : i32
    return %c0_i32, %c0_i32_0 : i32, i32
  }
  func.func @transform_4(%arg0: i32) -> (i32, i32) {
    %c0_i32 = arith.constant 0 : i32
    %c0_i32_0 = arith.constant 0 : i32
    return %arg0, %c0_i32 : i32, i32
  }
}

</mosaic_0001>

<bundles_post_ra>
// kernel: tpu_custom_call.1
= control target key start
LH: loop header
LB: loop body
LE: loop exit
PB: predicated region body
PF: predicated region fallthrough
CT: control target
= control target key end

     0   :  { %s733_s0 = inlined_call_operand.vmem [shape: f32[16,128], index: 0, kind: input, shape index: {}]   ;;  %s734_s1 = inlined_call_operand.vmem [shape: f32[1,128], index: 1, kind: input, shape index: {}]   ;;  %s735_s2 = inlined_call_operand.vmem [shape: f32[128,4], index: 2, kind: input, shape index: {}]   ;;  %s736_s3 = inlined_call_operand.vmem [shape: f32[4,128], index: 3, kind: input, shape index: {}]   ;;  %s737_s4 = inlined_call_operand.hbm [shape: f32[16,128], index: 4, kind: output, shape index: {}]  }
   0x1   :  { %v20_v0 = vld [vmem:[%s735_s2] sm:$0xff]  ;;  %v21_v1 = vld [vmem:[%s735_s2 + $0x8] sm:$0xff]  ;;  %v22_v2 = vld [vmem:[%s735_s2 + $0x10] sm:$0xff] }
   0x2   :  { %v532_v3 = vpack.c.bf16 %v21_v1, %v20_v0  ;;  %v23_v4 = vld [vmem:[%s735_s2 + $0x18] sm:$0xff]  ;;  %v24_v6 = vld [vmem:[%s735_s2 + $0x20] sm:$0xff]  ;;  %v25_v7 = vld [vmem:[%s735_s2 + $0x28] sm:$0xff] }
   0x3   :  { %v536_v5 = vpack.c.bf16 %v23_v4, %v22_v2  ;;  %v540_v8 = vpack.c.bf16 %v25_v7, %v24_v6  ;;  %v676_v9 = vld [vmem:[%s733_s0] sm:$0xff]  ;;  %v26_v10 = vld [vmem:[%s735_s2 + $0x30] sm:$0xff]  ;;  %v27_v11 = vld [vmem:[%s735_s2 + $0x38] sm:$0xff] }
   0x4   :  { %533 = vmatprep.subr.bf16.mxu0 %v532_v3  ;;  %565 = vmatprep.subr.bf16.mxu1 %v532_v3  ;;  %v112_v12 = vmul.f32 %v676_v9, %v676_v9 }
   0x5   :  { %535 = vmatpush3.bf16.msra.mxu0 %v532_v3  ;;  %567 = vmatpush3.bf16.msra.mxu1 %v532_v3 }
   0x6   :  { %537 = vmatprep.subr.bf16.mxu0 %v536_v5  ;;  %569 = vmatprep.subr.bf16.mxu1 %v536_v5 }
   0x7   :  { %484 = vmatprep.mubr.f32.mxu0 %v676_v9 }
   0x8   :  { %9 = vsyncpa [#allocation3], 0  ;;  %v544_v13 = vpack.c.bf16 %v27_v11, %v26_v10  ;;  %v28_v14 = vld [vmem:[%s735_s2 + $0x40] sm:$0xff]  ;;  %v29_v15 = vld [vmem:[%s735_s2 + $0x48] sm:$0xff]  ;;  %519 = vmatprep.mubr.f32.mxu1 %v112_v12  ;;  %vm210_vm0 = vcmask 1043456   ;;  %vm203_vm1 = vcmask 31744  }
   0x9   :  { %539 = vmatpush3.bf16.msra.mxu0 %v536_v5  ;;  %571 = vmatpush3.bf16.msra.mxu1 %v536_v5  ;;  %v548_v16 = vpack.c.bf16 %v29_v15, %v28_v14  ;;  %v30_v17 = vld [vmem:[%s735_s2 + $0x50] sm:$0xff]  ;;  %v31_v18 = vld [vmem:[%s735_s2 + $0x58] sm:$0xff]  ;;  %v32_v20 = vld [vmem:[%s735_s2 + $0x60] sm:$0xff]  ;;  %s627_s26 = smov [#allocation2]  }
   0xa   :  { %541 = vmatprep.subr.bf16.mxu0 %v540_v8  ;;  %573 = vmatprep.subr.bf16.mxu1 %v540_v8  ;;  %v552_v19 = vpack.c.bf16 %v31_v18, %v30_v17  ;;  %v33_v21 = vld [vmem:[%s735_s2 + $0x68] sm:$0xff]  ;;  %v34_v23 = vld [vmem:[%s735_s2 + $0x70] sm:$0xff]  ;;  %v35_v24 = vld [vmem:[%s735_s2 + $0x78] sm:$0xff]  ;;  %s392_s27 = sshll.u32 %s627_s26, 4  ;;  %s393_s27 = int_to_ptr.vmem [resolvable:$true] %s392_s27 }
   0xb   :  { %v556_v22 = vpack.c.bf16 %v33_v21, %v32_v20  ;;  %v560_v25 = vpack.c.bf16 %v35_v24, %v34_v23  ;;  %v19_v26 = vld [vmem:[%s733_s0 + $0x8] sm:$0xff]  ;;  %v36_v28 = vld [vmem:[%s736_s3] sm:$0xf]  ;;  %s603_s28 = scalar_lea.vmem %s393_s27, 256  ;;  %p608_p1 = scmp.lt.s32.totalorder %s393_s27, %s393_s27 }
   0xc   :  { %v113_v27 = vmul.f32 %v19_v26, %v19_v26  ;;  %v409_v54 = vld [vmem:[%s734_s1] ss:$0 sm:$0xff]  ;;  %p604_p0 = scmp.ne.s32.totalorder %s393_s27, %s603_s28  ;;  %p609_p2 = scmp.lt.s32.totalorder %s603_s28, %s603_s28 }
   0xd   :  { %543 = vmatpush3.bf16.msra.mxu0 %v540_v8  ;;  %575 = vmatpush3.bf16.msra.mxu1 %v540_v8 }
   0xe   :  { %545 = vmatprep.subr.bf16.mxu0 %v544_v13  ;;  %577 = vmatprep.subr.bf16.mxu1 %v544_v13  ;;  %p610_p3 = por %p609_p2, %p608_p1 }
  0x10   :  { %p611_p4 = pnand %p610_p3, %p604_p0 }
  0x11   :  { %547 = vmatpush3.bf16.msra.mxu0 %v544_v13  ;;  %579 = vmatpush3.bf16.msra.mxu1 %v544_v13 }
  0x12   :  { %549 = vmatprep.subr.bf16.mxu0 %v548_v16  ;;  %581 = vmatprep.subr.bf16.mxu1 %v548_v16 }
  0x15   :  { %551 = vmatpush3.bf16.msra.mxu0 %v548_v16  ;;  %583 = vmatpush3.bf16.msra.mxu1 %v548_v16 }
  0x16   :  { %553 = vmatprep.subr.bf16.mxu0 %v552_v19  ;;  %585 = vmatprep.subr.bf16.mxu1 %v552_v19 }
  0x19   :  { %555 = vmatpush3.bf16.msra.mxu0 %v552_v19  ;;  %587 = vmatpush3.bf16.msra.mxu1 %v552_v19 }
  0x1a   :  { %557 = vmatprep.subr.bf16.mxu0 %v556_v22  ;;  %589 = vmatprep.subr.bf16.mxu1 %v556_v22 }
  0x1d   :  { %559 = vmatpush3.bf16.msra.mxu0 %v556_v22  ;;  %591 = vmatpush3.bf16.msra.mxu1 %v556_v22 }
  0x1e   :  { %561 = vmatprep.subr.bf16.mxu0 %v560_v25  ;;  %593 = vmatprep.subr.bf16.mxu1 %v560_v25 }
  0x21   :  { %563 = vmatpush3.bf16.msra.mxu0 %v560_v25  ;;  %595 = vmatpush3.bf16.msra.mxu1 %v560_v25 }
  0x22   :  { %522 = vmatprep.subr.msk.mxu0 %vm210_vm0, %v36_v28  ;;  %527 = vmatprep.subr.msk.mxu1 %vm210_vm0, %v36_v28 }
  0x24   :  { %485 = vmatmul.mubr.f32.vlgmr.msra.gmra.mrb[0].mxu0 %v19_v26  ;;  %520 = vmatmul.mubr.f32.vlgmr.msra.gmra.mrb[0].mxu1 %v113_v27 }
  0x25   :  { %523 = vmatpush3.msk.msra.mxu0 %vm210_vm0, %v36_v28  ;;  %528 = vmatpush3.msk.msra.mxu1 %vm210_vm0, %v36_v28 }
  0xf7   :  { %v486_v29 = vpop.f32.mrb[0].mxu0  ;;  %v521_v30 = vpop.f32.mrb[0].mxu1 }
  0xf8   :  { %v190_v31 = vmul.f32 0.03125, %v486_v29  ;;  %v103_v32 = vpop.f32.mrb[1].mxu0  ;;  %v192_v33 = vmul.f32 0.03125, %v521_v30  ;;  %v180_v34 = vpop.f32.mrb[1].mxu1 }
  0xf9   :  { %v189_v35 = vmul.f32 0.03125, %v103_v32  ;;  %v191_v36 = vmul.f32 0.03125, %v180_v34 }
  0xfa   :  { %v194_v37 = vmul.f32 %v190_v31, %v190_v31 }
  0xfb   :  { %v193_v38 = vmul.f32 %v189_v35, %v189_v35 }
  0xfc   :  { %v196_v39 = vsub.f32 %v192_v33, %v194_v37 }
  0xfd   :  { %v195_v40 = vsub.f32 %v191_v36, %v193_v38 }
  0xfe   :  { %v198_v41 = vmax.f32 %v196_v39, 0.0 }
  0xff   :  { %v197_v42 = vmax.f32 %v195_v40, 0.0 }
 0x100   :  { %v200_v43 = vadd.f32 1e-05, %v198_v41 }
 0x101   :  { %v199_v44 = vadd.f32 1e-05, %v197_v42 }
 0x102   :  { %599 = vrsqrt.f32 %v200_v43 }
 0x103   :  { %601 = vrsqrt.f32 %v199_v44 }
 0x10c   :  { %v600_v45 = vpop.eup %599 }
 0x10d   :  { %v602_v46 = vpop.eup %601  ;;  %v290_v47 = vmul.f32 %v600_v45, %v190_v31 }
 0x10e   :  { %524 = vmatprep.mubr.msk.f32.mxu0 %vm203_vm1, %v602_v46  ;;  %v289_v48 = vmul.f32 %v602_v46, %v189_v35 }
 0x10f   :  { %525 = vmatmul.mubr.msk.f32.vlgmr.msra.gmra.mrb[2].mxu0 %vm203_vm1, %v600_v45 }
 0x110   :  { %529 = vmatprep.mubr.msk.f32.mxu1 %vm203_vm1, %v289_v48 }
 0x111   :  { %530 = vmatmul.mubr.msk.f32.vlgmr.msra.gmra.mrb[2].mxu1 %vm203_vm1, %v290_v47 }
 0x1e2   :  { %v526_v49 = vpop.f32.mrb[2].mxu0 }
 0x1e3   :  { %v373_v50 = vmul.f32 %v526_v49, %v19_v26  ;;  %v280_v51 = vpop.f32.mrb[3].mxu0 }
 0x1e4   :  { %v372_v52 = vmul.f32 %v280_v51, %v676_v9  ;;  %v531_v53 = vpop.f32.mrb[2].mxu1 }
 0x1e5   :  { %v375_v55 = vsub.f32 %v373_v50, %v531_v53  ;;  %v363_v56 = vpop.f32.mrb[3].mxu1 }
 0x1e6   :  { %v374_v57 = vsub.f32 %v372_v52, %v363_v56 }
 0x1e7   :  { %v384_v58 = vadd.f32 %v409_v54, %v375_v55 }
 0x1e8   :  { %v383_v59 = vadd.f32 %v409_v54, %v374_v57 }
 0x1e9   :  { %386 = vst [vmem:[#allocation2 + $0x8] sm:$0xff] %v384_v58 }
 0x1ea   :  { %385 = vst [vmem:[#allocation2] sm:$0xff] %v383_v59 }
 0x1eb   :  { %614 = shalt.err (!%p611_p4)
}
 0x1ec   :  { %s615_s1 = scalar_lea.hbm %s737_s4, 256 }
 0x1ed   :  { %p616_p5 = scmp.ne.s32.totalorder %s737_s4, %s615_s1  ;;  %p619_p6 = scmp.lt.u32.totalorder %s615_s1, %s737_s4 }
 0x1ef   :  { %p621_p7 = pnand %p619_p6, %p616_p5 }
 0x1f1   :  { %624 = shalt.err (!%p621_p7)
}
 0x1f2   :  { %s628_s9 = smov 128   ;;  %s629_s10 = smov 8  }
 0x1f3   :  { %398 = dma.vmem_to_hbm [thread:$0]  %s393_s27, 256, %s737_s4, [#allocation3], %s628_s9, %s628_s9, %s629_s10  }
 0x1f4   :  { %625 = dma.done.wait [#allocation3], 256  }
 0x1f5   :  { %626 = vsyncadd [#allocation3], 4294967040 }
 0x1f6   :  { %402 = vsyncpa [#allocation3], 1 }

</bundles_post_ra>
